<compile_context>
chip_gen: v7x
topology: tpu7x:2x2x1
jax: 0.10.0
libtpu: 0.0.40
codegen_flags: <defaults>
</compile_context>

<pallas_src>
import functools

import jax
import jax.numpy as jnp
from jax import lax
from jax.experimental import pallas as pl
from jax.experimental.pallas import tpu as pltpu


_LANES = 128  # chunk width for the decomposed gather (one lane group)


# ----------------------------------------------------------------------------
# Kernel 1: fused 1x1 conv + folded BN + ReLU + bilinear upsample -> table
# ----------------------------------------------------------------------------
def _table_kernel(x_ref, a_ref, shift_ref, kron_ref, o_ref):
    x = x_ref[...]                                    # (Cin, HWin)
    a = a_ref[...]                                    # (Cout, Cin), BN scale folded
    shift = shift_ref[...]                            # (Cout, 1)
    y = jnp.dot(a, x, preferred_element_type=jnp.float32) + shift
    y = jnp.maximum(y, 0.0)                           # (Cout, HWin)  conv+BN+ReLU
    kron = kron_ref[...]                              # (Q, HWin, 128)
    blocks = [jnp.dot(y, kron[q], preferred_element_type=jnp.float32)
              for q in range(kron.shape[0])]
    o_ref[...] = jnp.concatenate(blocks, axis=0)      # (Q*Cout, 128)


def build_table(x_t, a_mat, shift_col, kron_t):
    b, cin, hwin = x_t.shape
    cout = a_mat.shape[0]
    q_blocks, _, lanes = kron_t.shape
    return pl.pallas_call(
        _table_kernel,
        out_shape=jax.ShapeDtypeStruct((b, q_blocks * cout, lanes), jnp.float32),
        grid=(b,),
        in_specs=[
            pl.BlockSpec((None, cin, hwin), lambda i: (i, 0, 0)),
            pl.BlockSpec((cout, cin), lambda i: (0, 0)),
            pl.BlockSpec((cout, 1), lambda i: (0, 0)),
            pl.BlockSpec((q_blocks, hwin, lanes), lambda i: (0, 0, 0)),
        ],
        out_specs=pl.BlockSpec((None, q_blocks * cout, lanes),
                               lambda i: (i, 0, 0)),
        compiler_params=pltpu.CompilerParams(dimension_semantics=("parallel",)),
    )(x_t, a_mat, shift_col, kron_t)


# ----------------------------------------------------------------------------
# Kernel 2: per-voxel index_select via chunked (128-wide) bf16 one-hot matmul
#           output is lane-dense (b, C, N)
# ----------------------------------------------------------------------------
def _gather_kernel(idx_ref, w1t_ref, o_ref, *, cout, q_blocks, lanes):
    idx = idx_ref[...]                                # (1, blk) int32
    w1t = w1t_ref[...].astype(jnp.bfloat16)           # (Q*Cout, 128)
    blk = idx.shape[1]
    off = idx % lanes                                 # (1, blk) offset in chunk
    chunk = idx // lanes                              # (1, blk) chunk id
    off_iota = lax.broadcasted_iota(jnp.int32, (lanes, blk), 0)
    onehot = (off_iota == off).astype(jnp.bfloat16)   # (128, blk), exact 0/1
    # all Q chunk-candidates at once: (Q*Cout, 128) @ (128, blk)
    cand = jnp.dot(w1t, onehot, preferred_element_type=jnp.float32)
    acc = jnp.zeros((cout, blk), jnp.float32)
    for q in range(q_blocks):                         # pick the right chunk
        sel = (chunk == q).astype(jnp.float32)        # (1, blk)
        acc = acc + sel * cand[q * cout:(q + 1) * cout, :]
    o_ref[...] = acc                                  # (Cout, blk) lane-dense


def gather_rows(idx_pad, w1t, *, cout, blk, q_blocks, lanes):
    b, n_pad = idx_pad.shape
    qc = w1t.shape[1]
    assert blk % 128 == 0 and n_pad % blk == 0
    nb = n_pad // blk
    kernel = functools.partial(_gather_kernel, cout=cout,
                               q_blocks=q_blocks, lanes=lanes)
    return pl.pallas_call(
        kernel,
        out_shape=jax.ShapeDtypeStruct((b, cout, n_pad), jnp.float32),
        grid=(b, nb),                                 # table resident across nb
        in_specs=[
            pl.BlockSpec((1, blk), lambda i, j: (i, j)),          # lane-major idx
            pl.BlockSpec((None, qc, lanes), lambda i, j: (i, 0, 0)),
        ],
        out_specs=pl.BlockSpec((None, cout, blk), lambda i, j: (i, 0, j)),
        compiler_params=pltpu.CompilerParams(
            dimension_semantics=("parallel", "parallel"),
            vmem_limit_bytes=32 * 1024 * 1024),
    )(idx_pad, w1t)


# ----------------------------------------------------------------------------
# Kernel 3: ThreeDinit  (AvgPool3d(k=3, pad=1, stride=1) * (x==0) + x)
#           separable 3-tap sums, halo handled in-kernel (no HBM pad copy)
# ----------------------------------------------------------------------------
def _pool_init_kernel(x_ref, o_ref):
    x = x_ref[...]                                    # (cblk, D, H, W)

    def tap3(v, axis):
        n = v.shape[axis]
        zero = jnp.zeros_like(lax.slice_in_dim(v, 0, 1, axis=axis))
        fwd = jnp.concatenate(
            [lax.slice_in_dim(v, 1, n, axis=axis), zero], axis=axis)
        bwd = jnp.concatenate(
            [zero, lax.slice_in_dim(v, 0, n - 1, axis=axis)], axis=axis)
        return v + fwd + bwd

    s = tap3(tap3(tap3(x, 3), 2), 1)                  # separable 3x3x3 box sum
    pool = s * (1.0 / 27.0)                           # count_include_pad=True
    o_ref[...] = x + pool * (x == 0.0).astype(x.dtype)


def pool_init(seg):
    b, c, d, h, w = seg.shape
    cblk = 2 if c % 2 == 0 else 1   # conservative for v7x (64 MiB VMEM);
                                    # v5e/v6e could raise to 4-8 channels.
    return pl.pallas_call(
        _pool_init_kernel,
        out_shape=jax.ShapeDtypeStruct(seg.shape, seg.dtype),
        grid=(b, c // cblk),
        in_specs=[pl.BlockSpec((None, cblk, d, h, w),
                               lambda i, j: (i, j, 0, 0, 0))],
        out_specs=pl.BlockSpec((None, cblk, d, h, w),
                               lambda i, j: (i, j, 0, 0, 0)),
        compiler_params=pltpu.CompilerParams(
            dimension_semantics=("parallel", "parallel"),
            vmem_limit_bytes=32 * 1024 * 1024),
    )(seg)


# ----------------------------------------------------------------------------
# Glue (plain JAX): parameter folding, interpolation matrices, padding
# ----------------------------------------------------------------------------
def _bilinear_matrix(n_in, n_out):
    # F.interpolate(..., mode='bilinear', align_corners=True) along one axis.
    if n_in == 1:
        return jnp.ones((n_out, 1), jnp.float32)
    src = jnp.arange(n_out, dtype=jnp.float32) * (n_in - 1) / (n_out - 1)
    lo = jnp.clip(jnp.floor(src).astype(jnp.int32), 0, n_in - 2)
    frac = src - lo.astype(jnp.float32)
    rows = jnp.arange(n_out)
    m = jnp.zeros((n_out, n_in), jnp.float32)
    m = m.at[rows, lo].add(1.0 - frac)
    m = m.at[rows, lo + 1].add(frac)
    return m


def projection_forward(feature2d, depth_mapping_3d, conv_w, bn_scale, bn_shift,
                       out_3d=(60, 36, 60), three_d_init=True, scale_factor=16,
                       gather_blk=8192):
    b, cin, h, w = feature2d.shape
    cout = conv_w.shape[0]
    hout, wout = scale_factor * h, scale_factor * w
    hw = hout * wout
    lanes = _LANES
    q_blocks = -(-(hw + 1) // lanes)        # +1: appended "unmapped" zero row
    r_pad = q_blocks * lanes

    # bilinear interpolation as a Kronecker matrix, pre-chunked for the table
    interp_h = _bilinear_matrix(h, hout)                       # (hout, h)
    interp_w = _bilinear_matrix(w, wout)                       # (wout, w)
    kron = jnp.kron(interp_h, interp_w)                        # (hw, h*w)
    kron = jnp.pad(kron, ((0, r_pad - hw), (0, 0)))            # zero rows >= hw
    kron_t = jnp.transpose(kron.reshape(q_blocks, lanes, h * w), (0, 2, 1))

    # fold eval-mode BN scale into the 1x1 conv weight
    a_mat = conv_w.astype(jnp.float32) * bn_scale[:, None]     # (cout, cin)
    shift_col = bn_shift.reshape(cout, 1).astype(jnp.float32)
    x_t = feature2d.reshape(b, cin, h * w)                     # free reshape

    w1t = build_table(x_t, a_mat, shift_col, kron_t)           # (b, Q*cout, 128)

    # per-voxel index_select, lane-dense output (b, cout, N_pad)
    n3 = out_3d[0] * out_3d[1] * out_3d[2]
    assert depth_mapping_3d.shape == (b, n3)
    n_pad = -(-n3 // gather_blk) * gather_blk
    idx = depth_mapping_3d.astype(jnp.int32)
    idx = jnp.pad(idx, ((0, 0), (0, n_pad - n3)), constant_values=hw)
    gathered = gather_rows(idx, w1t, cout=cout, blk=gather_blk,
                           q_blocks=q_blocks, lanes=lanes)

    segres = gathered[:, :, :n3].reshape(b, cout, *out_3d)

    if three_d_init:
        segres = pool_init(segres)
    return segres


# ----------------------------------------------------------------------------
# Pure-JAX reference (numerical sanity check)
# ----------------------------------------------------------------------------
def projection_reference(feature2d, dm3d, conv_w, bn_scale, bn_shift,
                         out_3d=(60, 36, 60), scale_factor=16):
    hp = jax.lax.Precision.HIGHEST
    b, cin, h, w = feature2d.shape
    cout = conv_w.shape[0]
    x = jnp.einsum('bchw,fc->bfhw', feature2d, conv_w, precision=hp)
    x = jnp.maximum(x * bn_scale[None, :, None, None]
                    + bn_shift[None, :, None, None], 0.0)
    hout, wout = scale_factor * h, scale_factor * w
    a = _bilinear_matrix(h, hout)
    bm = _bilinear_matrix(w, wout)
    up = jnp.einsum('oh,bchw->bcow', a, x, precision=hp)
    up = jnp.einsum('bcow,vw->bcov', up, bm, precision=hp)
    flat = jnp.transpose(up, (0, 2, 3, 1)).reshape(b, hout * wout, cout)
    table = jnp.concatenate([flat, jnp.zeros((b, 1, cout), flat.dtype)], axis=1)
    gathered = jnp.take_along_axis(table, dm3d[:, :, None].astype(jnp.int32),
                                   axis=1)
    seg = jnp.transpose(gathered, (0, 2, 1)).reshape(b, cout, *out_3d)
    pad = jnp.pad(seg, ((0, 0), (0, 0), (1, 1), (1, 1), (1, 1)))
    d, hh, ww = out_3d
    acc = sum(pad[:, :, dz:dz + d, dy:dy + hh, dx:dx + ww]
              for dz in range(3) for dy in range(3) for dx in range(3))
    pool = acc / 27.0
    return seg + pool * (seg == 0.0).astype(seg.dtype)


# ----------------------------------------------------------------------------
if __name__ == "__main__":
    B = 2
    RESNET_OUT = 16      # resnet_out != feature  ->  downsample branch is taken
    FEATURE = 8
    H_IN, W_IN = 2, 2    # small 2D feature map; x16 upsample -> 32 x 32
    D3, H3, W3 = 60, 36, 60   # hardcoded in the module's .view(b, c, 60, 36, 60)
    N3 = D3 * H3 * W3

    key = jax.random.PRNGKey(0)
    kx, kidx, kw, kg, kb, km, kv = jax.random.split(key, 7)

    feature2d = jax.random.normal(kx, (B, RESNET_OUT, H_IN, W_IN), jnp.float32)
    HW = (16 * H_IN) * (16 * W_IN)
    # values in [0, HW]; value HW selects the appended zero row ("no mapping")
    depth_mapping_3d = jax.random.randint(kidx, (B, N3), 0, HW + 1, jnp.int32)

    # deterministic synthetic parameters (conv weight + eval-mode BN stats)
    conv_w = 0.1 * jax.random.normal(kw, (FEATURE, RESNET_OUT), jnp.float32)
    gamma = 1.0 + 0.1 * jax.random.normal(kg, (FEATURE,), jnp.float32)
    beta = 0.1 * jax.random.normal(kb, (FEATURE,), jnp.float32)
    run_mean = 0.1 * jax.random.normal(km, (FEATURE,), jnp.float32)
    run_var = 1.0 + 0.1 * jnp.abs(jax.random.normal(kv, (FEATURE,), jnp.float32))
    eps = 1e-5
    # TODO(synk): training-mode BatchNorm (batch statistics) is not modeled;
    # eval-mode running stats are folded into a per-channel affine.
    bn_scale = gamma / jnp.sqrt(run_var + eps)
    bn_shift = beta - run_mean * bn_scale

    out = projection_forward(feature2d, depth_mapping_3d, conv_w, bn_scale,
                             bn_shift, out_3d=(D3, H3, W3), three_d_init=True)
    out = jax.block_until_ready(out)

    assert out.shape == (B, FEATURE, D3, H3, W3), out.shape
    ref = projection_reference(feature2d, depth_mapping_3d, conv_w, bn_scale,
                               bn_shift, out_3d=(D3, H3, W3))
    # bf16 table inside the gather kernel costs ~2^-8 relative accuracy
    err = float(jnp.max(jnp.abs(out - ref)))
    assert err < 2e-2, f"max abs error {err}"

    print("KERNEL_OK")
</pallas_src>

<mosaic_0001>
module attributes {stable_mosaic.version = 11 : i64} {
  func.func @_table_kernel(%arg0: i32, %arg1: memref<1x16x4xf32, #tpu.memory_space<vmem>>, %arg2: memref<8x16xf32, #tpu.memory_space<vmem>>, %arg3: memref<8x1xf32, #tpu.memory_space<vmem>>, %arg4: memref<9x4x128xf32, #tpu.memory_space<vmem>>, %arg5: memref<1x72x128xf32, #tpu.memory_space<vmem>>) attributes {dimension_semantics = [#tpu.dimension_semantics<parallel>], iteration_bounds = array<i64: 2>, scalar_prefetch = 0 : i64, scratch_operands = 0 : i64, tpu.core_type = #tpu.core_type<tc>, window_params = [{transform_indices = @transform_0, window_bounds = array<i64: 1, 16, 4>}, {pipeline_mode = #tpu.pipeline_mode<synchronous>, transform_indices = @transform_1, window_bounds = array<i64: 8, 16>}, {pipeline_mode = #tpu.pipeline_mode<synchronous>, transform_indices = @transform_2, window_bounds = array<i64: 8, 1>}, {pipeline_mode = #tpu.pipeline_mode<synchronous>, transform_indices = @transform_3, window_bounds = array<i64: 9, 4, 128>}, {transform_indices = @transform_4, window_bounds = array<i64: 1, 72, 128>}]} {
    %c0 = arith.constant 0 : index
    %c0_0 = arith.constant 0 : index
    %c0_1 = arith.constant 0 : index
    %0 = vector.load %arg1[%c0, %c0_0, %c0_1] : memref<1x16x4xf32, #tpu.memory_space<vmem>>, vector<1x16x4xf32>
    %1 = vector.shape_cast %0 : vector<1x16x4xf32> to vector<16x4xf32>
    %c0_2 = arith.constant 0 : index
    %c0_3 = arith.constant 0 : index
    %2 = vector.load %arg2[%c0_2, %c0_3] : memref<8x16xf32, #tpu.memory_space<vmem>>, vector<8x16xf32>
    %c0_4 = arith.constant 0 : index
    %c0_5 = arith.constant 0 : index
    %3 = vector.load %arg3[%c0_4, %c0_5] : memref<8x1xf32, #tpu.memory_space<vmem>>, vector<8x1xf32>
    %cst = arith.constant dense<0.000000e+00> : vector<8x4xf32>
    %4 = tpu.matmul %2, %1, %cst {dimension_numbers = #tpu.dot_dimension_numbers<[1], [0], [0], [1], [0, 0, 1, 1], [], []>} : vector<8x16xf32>, vector<16x4xf32>, vector<8x4xf32> -> vector<8x4xf32>
    %5 = vector.broadcast %3 : vector<8x1xf32> to vector<8x4xf32>
    %6 = arith.addf %4, %5 : vector<8x4xf32>
    %cst_6 = arith.constant 0.000000e+00 : f32
    %7 = vector.broadcast %cst_6 : f32 to vector<8x4xf32>
    %8 = arith.maximumf %6, %7 : vector<8x4xf32>
    %c0_7 = arith.constant 0 : index
    %c0_8 = arith.constant 0 : index
    %c0_9 = arith.constant 0 : index
    %9 = vector.load %arg4[%c0_7, %c0_8, %c0_9] : memref<9x4x128xf32, #tpu.memory_space<vmem>>, vector<9x4x128xf32>
    %10 = vector.extract_strided_slice %9 {offsets = [0, 0, 0], sizes = [1, 4, 128], strides = [1, 1, 1]} : vector<9x4x128xf32> to vector<1x4x128xf32>
    %11 = vector.shape_cast %10 : vector<1x4x128xf32> to vector<4x128xf32>
    %cst_10 = arith.constant dense<0.000000e+00> : vector<8x128xf32>
    %12 = tpu.matmul %8, %11, %cst_10 {dimension_numbers = #tpu.dot_dimension_numbers<[1], [0], [0], [1], [0, 0, 1, 1], [], []>} : vector<8x4xf32>, vector<4x128xf32>, vector<8x128xf32> -> vector<8x128xf32>
    %13 = vector.extract_strided_slice %9 {offsets = [1, 0, 0], sizes = [1, 4, 128], strides = [1, 1, 1]} : vector<9x4x128xf32> to vector<1x4x128xf32>
    %14 = vector.shape_cast %13 : vector<1x4x128xf32> to vector<4x128xf32>
    %cst_11 = arith.constant dense<0.000000e+00> : vector<8x128xf32>
    %15 = tpu.matmul %8, %14, %cst_11 {dimension_numbers = #tpu.dot_dimension_numbers<[1], [0], [0], [1], [0, 0, 1, 1], [], []>} : vector<8x4xf32>, vector<4x128xf32>, vector<8x128xf32> -> vector<8x128xf32>
    %16 = vector.extract_strided_slice %9 {offsets = [2, 0, 0], sizes = [1, 4, 128], strides = [1, 1, 1]} : vector<9x4x128xf32> to vector<1x4x128xf32>
    %17 = vector.shape_cast %16 : vector<1x4x128xf32> to vector<4x128xf32>
    %cst_12 = arith.constant dense<0.000000e+00> : vector<8x128xf32>
    %18 = tpu.matmul %8, %17, %cst_12 {dimension_numbers = #tpu.dot_dimension_numbers<[1], [0], [0], [1], [0, 0, 1, 1], [], []>} : vector<8x4xf32>, vector<4x128xf32>, vector<8x128xf32> -> vector<8x128xf32>
    %19 = vector.extract_strided_slice %9 {offsets = [3, 0, 0], sizes = [1, 4, 128], strides = [1, 1, 1]} : vector<9x4x128xf32> to vector<1x4x128xf32>
    %20 = vector.shape_cast %19 : vector<1x4x128xf32> to vector<4x128xf32>
    %cst_13 = arith.constant dense<0.000000e+00> : vector<8x128xf32>
    %21 = tpu.matmul %8, %20, %cst_13 {dimension_numbers = #tpu.dot_dimension_numbers<[1], [0], [0], [1], [0, 0, 1, 1], [], []>} : vector<8x4xf32>, vector<4x128xf32>, vector<8x128xf32> -> vector<8x128xf32>
    %22 = vector.extract_strided_slice %9 {offsets = [4, 0, 0], sizes = [1, 4, 128], strides = [1, 1, 1]} : vector<9x4x128xf32> to vector<1x4x128xf32>
    %23 = vector.shape_cast %22 : vector<1x4x128xf32> to vector<4x128xf32>
    %cst_14 = arith.constant dense<0.000000e+00> : vector<8x128xf32>
    %24 = tpu.matmul %8, %23, %cst_14 {dimension_numbers = #tpu.dot_dimension_numbers<[1], [0], [0], [1], [0, 0, 1, 1], [], []>} : vector<8x4xf32>, vector<4x128xf32>, vector<8x128xf32> -> vector<8x128xf32>
    %25 = vector.extract_strided_slice %9 {offsets = [5, 0, 0], sizes = [1, 4, 128], strides = [1, 1, 1]} : vector<9x4x128xf32> to vector<1x4x128xf32>
    %26 = vector.shape_cast %25 : vector<1x4x128xf32> to vector<4x128xf32>
    %cst_15 = arith.constant dense<0.000000e+00> : vector<8x128xf32>
    %27 = tpu.matmul %8, %26, %cst_15 {dimension_numbers = #tpu.dot_dimension_numbers<[1], [0], [0], [1], [0, 0, 1, 1], [], []>} : vector<8x4xf32>, vector<4x128xf32>, vector<8x128xf32> -> vector<8x128xf32>
    %28 = vector.extract_strided_slice %9 {offsets = [6, 0, 0], sizes = [1, 4, 128], strides = [1, 1, 1]} : vector<9x4x128xf32> to vector<1x4x128xf32>
    %29 = vector.shape_cast %28 : vector<1x4x128xf32> to vector<4x128xf32>
    %cst_16 = arith.constant dense<0.000000e+00> : vector<8x128xf32>
    %30 = tpu.matmul %8, %29, %cst_16 {dimension_numbers = #tpu.dot_dimension_numbers<[1], [0], [0], [1], [0, 0, 1, 1], [], []>} : vector<8x4xf32>, vector<4x128xf32>, vector<8x128xf32> -> vector<8x128xf32>
    %31 = vector.extract_strided_slice %9 {offsets = [7, 0, 0], sizes = [1, 4, 128], strides = [1, 1, 1]} : vector<9x4x128xf32> to vector<1x4x128xf32>
    %32 = vector.shape_cast %31 : vector<1x4x128xf32> to vector<4x128xf32>
    %cst_17 = arith.constant dense<0.000000e+00> : vector<8x128xf32>
    %33 = tpu.matmul %8, %32, %cst_17 {dimension_numbers = #tpu.dot_dimension_numbers<[1], [0], [0], [1], [0, 0, 1, 1], [], []>} : vector<8x4xf32>, vector<4x128xf32>, vector<8x128xf32> -> vector<8x128xf32>
    %34 = vector.extract_strided_slice %9 {offsets = [8, 0, 0], sizes = [1, 4, 128], strides = [1, 1, 1]} : vector<9x4x128xf32> to vector<1x4x128xf32>
    %35 = vector.shape_cast %34 : vector<1x4x128xf32> to vector<4x128xf32>
    %cst_18 = arith.constant dense<0.000000e+00> : vector<8x128xf32>
    %36 = tpu.matmul %8, %35, %cst_18 {dimension_numbers = #tpu.dot_dimension_numbers<[1], [0], [0], [1], [0, 0, 1, 1], [], []>} : vector<8x4xf32>, vector<4x128xf32>, vector<8x128xf32> -> vector<8x128xf32>
    %37 = tpu.concatenate %12, %15, %18, %21, %24, %27, %30, %33, %36 in 0 : vector<8x128xf32>, vector<8x128xf32>, vector<8x128xf32>, vector<8x128xf32>, vector<8x128xf32>, vector<8x128xf32>, vector<8x128xf32>, vector<8x128xf32>, vector<8x128xf32> -> vector<72x128xf32>
    %c0_19 = arith.constant 0 : index
    %c0_20 = arith.constant 0 : index
    %c0_21 = arith.constant 0 : index
    %38 = vector.load %arg5[%c0_19, %c0_20, %c0_21] : memref<1x72x128xf32, #tpu.memory_space<vmem>>, vector<1x72x128xf32>
    %39 = vector.shape_cast %38 : vector<1x72x128xf32> to vector<72x128xf32>
    %40 = vector.shape_cast %37 : vector<72x128xf32> to vector<1x72x128xf32>
    tpu.vector_store %arg5[%c0_19, %c0_20, %c0_21], %40 {strides = array<i32>} : memref<1x72x128xf32, #tpu.memory_space<vmem>>, vector<1x72x128xf32>,
    return
  }
  func.func @transform_0(%arg0: i32) -> (i32, i32, i32) {
    %c0_i32 = arith.constant 0 : i32
    %c0_i32_0 = arith.constant 0 : i32
    %c0_i32_1 = arith.constant 0 : i32
    return %arg0, %c0_i32, %c0_i32_0 : i32, i32, i32
  }
  func.func @transform_1(%arg0: i32) -> (i32, i32) {
    %c0_i32 = arith.constant 0 : i32
    %c0_i32_0 = arith.constant 0 : i32
    %c0_i32_1 = arith.constant 0 : i32
    return %c0_i32, %c0_i32_0 : i32, i32
  }
  func.func @transform_2(%arg0: i32) -> (i32, i32) {
    %c0_i32 = arith.constant 0 : i32
    %c0_i32_0 = arith.constant 0 : i32
    %c0_i32_1 = arith.constant 0 : i32
    return %c0_i32, %c0_i32_0 : i32, i32
  }
  func.func @transform_3(%arg0: i32) -> (i32, i32, i32) {
    %c0_i32 = arith.constant 0 : i32
    %c0_i32_0 = arith.constant 0 : i32
    %c0_i32_1 = arith.constant 0 : i32
    %c0_i32_2 = arith.constant 0 : i32
    return %c0_i32, %c0_i32_0, %c0_i32_1 : i32, i32, i32
  }
  func.func @transform_4(%arg0: i32) -> (i32, i32, i32) {
    %c0_i32 = arith.constant 0 : i32
    %c0_i32_0 = arith.constant 0 : i32
    %c0_i32_1 = arith.constant 0 : i32
    return %arg0, %c0_i32, %c0_i32_0 : i32, i32, i32
  }
}

</mosaic_0001>

<bundles_post_ra>
// kernel: tpu_custom_call.1
= control target key start
LH: loop header
LB: loop body
LE: loop exit
PB: predicated region body
PF: predicated region fallthrough
CT: control target
= control target key end

     0   :  { %9 = vsyncpa [#allocation3], 0  ;;  %s1472_s0 = inlined_call_operand.vmem [shape: f32[2,16,4], index: 0, kind: input, shape index: {}]   ;;  %s1473_s1 = inlined_call_operand.vmem [shape: f32[8,16], index: 1, kind: input, shape index: {}]   ;;  %s1474_s2 = inlined_call_operand.vmem [shape: f32[8,1], index: 2, kind: input, shape index: {}]   ;;  %s1475_s3 = inlined_call_operand.vmem [shape: f32[9,4,128], index: 3, kind: input, shape index: {}]   ;;  %s1476_s4 = inlined_call_operand.hbm [shape: f32[2,72,128], index: 4, kind: output, shape index: {}]  }
   0x1   :  { %11 = vsyncpa [#allocation3 + $0x1], 0  ;;  %s1285_s15 = smov 0   ;;  %s1287_s16 = smov 0  }
   0x2   :  { %s1289_s17 = smov 0   ;;  %s1291_s18 = smov 0  }
   0x3 LB: > { %s1306_s19 = sadd.s32 4294967295, %s1251_s18   ;;  %s1036_s20 = sadd.s32 4294967294, %s1251_s18   ;;  %s1251_s18 = sphi %s1291_s18, %s1482_s18   ;;  %s1247_s17 = sphi %s1289_s17, %s1481_s17   ;;  %s1243_s16 = sphi %s1287_s16, %s1480_s16   ;;  %s1239_s15 = sphi %s1285_s15, %s1479_s15  }
   0x4   : > { %s1310_s21 = sadd.s32 1, %s1251_s18   ;;  %s113_s22 = sadd.s32 1, %s1247_s17 }
   0x5   : > { %s110_s23 = ssub.s32 %s1251_s18, %s1310_s21  ;;  %p123_p0 = scmp.ne.s32.totalorder %s1247_s17, %s1243_s16 }
   0x6   : > { %p111_p1 = scmp.eq.s32.totalorder %s110_s23, 0  ;;  %p124_p2 = scmp.eq.s32.totalorder %s1306_s19, 1 }
   0x7   : > { %p129_p3 = scmp.ne.s32.totalorder %s1243_s16, %s1239_s15  ;;  %p130_p4 = scmp.eq.s32.totalorder %s1036_s20, 1 }
   0x8   : > { %s1321_s24 = scalar_select %p111_p1, %s1247_s17, %s113_s22  }
   0x9   : > { %p1323_p5 = por %p124_p2, %p123_p0  ;;  %p1327_p6 = por %p130_p4, %p129_p3 }
   0xa   : > { %p1039_p7 = scmp.ge.s32.totalorder %s1251_s18, 1  ;;  %p165_p8 = scmp.lt.s32.totalorder %s1251_s18, 3 }
   0xc   : > { %p166_p9 = pnand %p1039_p7, %p165_p8 }
   0xd   : > { %p191_p10 = scmp.lt.s32.totalorder (!%p166_p9), %s1306_s19, 1  ;;  %v1253_v0 = vmov (!%p166_p9), 0.0|0.0   ;;  %vm1254_vm0 = vmmov (!%p166_p9), 0   ;;  %v1255_v1 = vmov (!%p166_p9), 0.0   ;;  %v199_v2 = vld [vmem:[%s1474_s2] sm:$0xff] (!%p166_p9)  ;;  %v1256_v3 = vmov (!%p166_p9), 0  }
   0xe   : > { %169 = sbr.rel (%p166_p9) target bundleno = 490 (0x1ea), region = 36  ;;  %1138 = vmatprep.subr.bf16.mxu0 (!%p166_p9), %v1253_v0  ;;  %1090 = vmatprep.mubr.msk.f32.mxu0 (!%p166_p9), %vm1254_vm0, %v1255_v1  ;;  %v198_v7 = vld [vmem:[%s1473_s1] sm:$0xff] (!%p166_p9)  ;;  %vm205_vm1 = vcmask (!%p166_p9), 130048   ;;  %vm293_vm2 = vcmask (!%p166_p9), 1043456   ;;  %v282_v9 = vld [vmem:[%s1475_s3 + $0x8] sm:$0xf] (!%p166_p9) }
   0xf   : > { %1188 = vset.pattern.permute.xlu0 (!%p166_p9), %v1256_v3  ;;  %1093 = vmatprep.subr.mxu1 (!%p166_p9), %v1255_v1  ;;  %v280_v8 = vld [vmem:[%s1475_s3] sm:$0xf] (!%p166_p9)  ;;  %vm289_vm3 = vcmask (!%p166_p9), 31744   ;;  %v281_v15 = vld [vmem:[%s1475_s3 + $0x4] sm:$0xf] (!%p166_p9)  ;;  %s188_s11 = sand.u32 (!%p166_p9), 1, %s1243_s16  }
  0x10   : > { %202 = vperm.xlu0 (!%p166_p9), %1188, %v199_v2   ;;  %1095 = vmatprep.mubr.msk.f32.mxu1 (!%p166_p9), %vm1254_vm0, %v1255_v1  ;;  %v284_v16 = vld [vmem:[%s1475_s3 + $0x10] sm:$0xf] (!%p166_p9)  ;;  %v283_v17 = vld [vmem:[%s1475_s3 + $0xc] sm:$0xf] (!%p166_p9)  ;;  %v286_v18 = vld [vmem:[%s1475_s3 + $0x18] sm:$0xf] (!%p166_p9) }
  0x11   : > { %1094 = vmatpush3.msk.msra.mxu1 (!%p166_p9), %vm293_vm2, %v280_v8  ;;  %v285_v19 = vld [vmem:[%s1475_s3 + $0x14] sm:$0xf] (!%p166_p9)  ;;  %v288_v20 = vld [vmem:[%s1475_s3 + $0x20] sm:$0xf] (!%p166_p9)  ;;  %v287_v21 = vld [vmem:[%s1475_s3 + $0x1c] sm:$0xf] (!%p166_p9) }
  0x12   : > { %1098 = vmatprep.subr.mxu1 (!%p166_p9), %v1255_v1  ;;  %s1141_s12 = smul.u32 (!%p166_p9), 72, %s188_s11 }
  0x13   : > { %s1142_s14 = smul.u32 (!%p166_p9), 1152, %s1306_s19 }
  0x14   : > { %s190_s13 = scalar_lea.vmem (!%p166_p9), [#allocation2], %s1141_s12 }
  0x15   : > { %s192_s29 = scalar_select %p191_p10, %s1306_s19, 1 }
  0x16   : > { %s974_s20 = sshll.u32 %s190_s13, 4  ;;  %s1425_s27 = scalar_lea.hbm %s1476_s4, %s1142_s14  ;;  %s1427_s20 = int_to_ptr.vmem [resolvable:$true] %s974_s20 }
  0x17   : > { %s1064_s30 = sshll.u32 %s192_s29, 4  ;;  %s1431_s19 = scalar_lea.sflag [#allocation3], %s188_s11 }
  0x18   : > { %s195_s7 = scalar_lea.vmem %s1472_s0, %s1064_s30  ;;  %s1189_s28 = scalar_lea.vmem %s1427_s20, 1152 }
  0x19   : > { %v196_v4 = vld [vmem:[%s195_s7] sm:$0xff]  ;;  %v197_v5 = vld [vmem:[%s195_s7 + $0x8] sm:$0xff]  ;;  %p1190_p11 = scmp.ne.s32.totalorder %s1427_s20, %s1189_s28  ;;  %s1257_s29 = smov [#allocation2]  }
  0x1a   : > { %v1139_v6 = vpack.c.bf16 %v197_v5, %v196_v4  ;;  %s1193_s30 = sshll.u32 %s1257_s29, 4  ;;  %s1194_s30 = int_to_ptr.vmem [resolvable:$false] %s1193_s30 }
  0x1b   : > { %p1191_p12 = pnand %p1190_p11, %p1323_p5  ;;  %s1195_s5 = scalar_lea.vmem %s1194_s30, 2304 }
  0x1c   : > { %1140 = vmatpush3.bf16.msra.mxu0 %v1139_v6  ;;  %p1196_p0 = scmp.lt.s32.totalorder %s1427_s20, %s1194_s30  ;;  %p1197_p1 = scmp.lt.s32.totalorder %s1195_s5, %s1189_s28 }
  0x1d   : > { %1103 = vmatprep.subr.mxu0 %v1255_v1  ;;  %p1192_p13 = pneg %p1191_p12 }
  0x1e   : > { %p1198_p2 = por %p1197_p1, %p1196_p0 }
  0x1f   : > { %1091 = vmatmul.mubr.msk.f32.vlgmr.msra.gmra.mrb[0].mxu0 %vm205_vm1, %v198_v7 }
  0x20   : > { %1105 = vmatprep.mubr.msk.f32.mxu0 %vm1254_vm0, %v1255_v1  ;;  %1104 = vmatpush3.msk.msra.mxu0 %vm293_vm2, %v282_v9  ;;  %p1199_p3 = pnand %p1198_p2, %p1192_p13 }
  0x21   : > { %1113 = vmatprep.subr.mxu0 %v1255_v1 }
  0x8f   : > { %v203_v10 = vpop.permute.xlu0 %202 }
  0xf2   : > { %v275_v11 = vpop.f32.mrb[0].mxu0 }
  0xf3   : > { %v276_v12 = vadd.f32 %v275_v11, %v203_v10  ;;  %v1092_v13 = vpop.f32.mrb[1].mxu0 }
  0xf5   : > { %v279_v14 = vmax.f32 %v276_v12, 0.0 }
  0xf7   : > { %1096 = vmatmul.mubr.msk.f32.vlgmr.msra.gmra.mrb[0].mxu1 %vm289_vm3, %v279_v14  ;;  %1106 = vmatmul.mubr.msk.f32.vlgmr.msra.gmra.mrb[2].mxu0 %vm289_vm3, %v279_v14 }
  0xf8   : > { %1099 = vmatpush3.msk.msra.mxu1 %vm293_vm2, %v281_v15  ;;  %1100 = vmatprep.mubr.msk.f32.mxu1 %vm1254_vm0, %v1255_v1 }
  0xf9   : > { %1108 = vmatprep.subr.mxu1 %v1255_v1  ;;  %1114 = vmatpush3.msk.msra.mxu0 %vm293_vm2, %v284_v16 }
  0xfa   : > { %1115 = vmatprep.mubr.msk.f32.mxu0 %vm1254_vm0, %v1255_v1  ;;  %1123 = vmatprep.subr.mxu0 %v1255_v1 }
  0xfb   : > { %1101 = vmatmul.mubr.msk.f32.vlgmr.msra.gmra.mrb[2].mxu1 %vm289_vm3, %v279_v14  ;;  %1116 = vmatmul.mubr.msk.f32.vlgmr.msra.gmra.mrb[4].mxu0 %vm289_vm3, %v279_v14 }
  0xfc   : > { %1109 = vmatpush3.msk.msra.mxu1 %vm293_vm2, %v283_v17  ;;  %1110 = vmatprep.mubr.msk.f32.mxu1 %vm1254_vm0, %v1255_v1 }
  0xfd   : > { %1118 = vmatprep.subr.mxu1 %v1255_v1  ;;  %1124 = vmatpush3.msk.msra.mxu0 %vm293_vm2, %v286_v18 }
  0xfe   : > { %1125 = vmatprep.mubr.msk.f32.mxu0 %vm1254_vm0, %v1255_v1  ;;  %1133 = vmatprep.subr.mxu0 %v1255_v1 }
  0xff   : > { %1111 = vmatmul.mubr.msk.f32.vlgmr.msra.gmra.mrb[4].mxu1 %vm289_vm3, %v279_v14  ;;  %1126 = vmatmul.mubr.msk.f32.vlgmr.msra.gmra.mrb[6].mxu0 %vm289_vm3, %v279_v14 }
 0x100   : > { %1119 = vmatpush3.msk.msra.mxu1 %vm293_vm2, %v285_v19  ;;  %1120 = vmatprep.mubr.msk.f32.mxu1 %vm1254_vm0, %v1255_v1 }
 0x101   : > { %1128 = vmatprep.subr.mxu1 %v1255_v1  ;;  %1134 = vmatpush3.msk.msra.mxu0 %vm293_vm2, %v288_v20 }
 0x102   : > { %1135 = vmatprep.mubr.msk.f32.mxu0 %vm1254_vm0, %v1255_v1 }
 0x103   : > { %1121 = vmatmul.mubr.msk.f32.vlgmr.msra.gmra.mrb[6].mxu1 %vm289_vm3, %v279_v14  ;;  %1136 = vmatmul.mubr.msk.f32.vlgmr.msra.gmra.mrb[8].mxu0 %vm289_vm3, %v279_v14 }
 0x104   : > { %1129 = vmatpush3.msk.msra.mxu1 %vm293_vm2, %v287_v21  ;;  %1130 = vmatprep.mubr.msk.f32.mxu1 %vm1254_vm0, %v1255_v1 }
 0x107   : > { %1131 = vmatmul.mubr.msk.f32.vlgmr.msra.gmra.mrb[8].mxu1 %vm289_vm3, %v279_v14 }
 0x1ca   : > { %v363_v22 = vpop.f32.mrb[0].mxu1  ;;  %v509_v23 = vpop.f32.mrb[2].mxu0 }
 0x1cb   : > { %951 = vst [vmem:[%s190_s13] sm:$0xff] %v363_v22  ;;  %953 = vst [vmem:[%s190_s13 + $0x10] sm:$0xff] %v509_v23  ;;  %v1097_v24 = vpop.f32.mrb[1].mxu1  ;;  %v1107_v25 = vpop.f32.mrb[3].mxu0 }
 0x1ce   : > { %v436_v26 = vpop.f32.mrb[2].mxu1  ;;  %v655_v27 = vpop.f32.mrb[4].mxu0 }
 0x1cf   : > { %952 = vst [vmem:[%s190_s13 + $0x8] sm:$0xff] %v436_v26  ;;  %955 = vst [vmem:[%s190_s13 + $0x20] sm:$0xff] %v655_v27  ;;  %v1102_v28 = vpop.f32.mrb[3].mxu1  ;;  %v1117_v29 = vpop.f32.mrb[5].mxu0 }
 0x1d2   : > { %v582_v30 = vpop.f32.mrb[4].mxu1  ;;  %v801_v31 = vpop.f32.mrb[6].mxu0 }
 0x1d3   : > { %954 = vst [vmem:[%s190_s13 + $0x18] sm:$0xff] %v582_v30  ;;  %957 = vst [vmem:[%s190_s13 + $0x30] sm:$0xff] %v801_v31  ;;  %v1112_v32 = vpop.f32.mrb[5].mxu1  ;;  %v1127_v33 = vpop.f32.mrb[7].mxu0 }
 0x1d6   : > { %v728_v34 = vpop.f32.mrb[6].mxu1  ;;  %v947_v35 = vpop.f32.mrb[8].mxu0 }
 0x1d7   : > { %956 = vst [vmem:[%s190_s13 + $0x28] sm:$0xff] %v728_v34  ;;  %959 = vst [vmem:[%s190_s13 + $0x40] sm:$0xff] %v947_v35  ;;  %v1122_v36 = vpop.f32.mrb[7].mxu1  ;;  %v1137_v37 = vpop.f32.mrb[9].mxu0 }
 0x1da   : > { %v874_v38 = vpop.f32.mrb[8].mxu1 }
 0x1db   : > { %958 = vst [vmem:[%s190_s13 + $0x38] sm:$0xff] %v874_v38  ;;  %v1132_v39 = vpop.f32.mrb[9].mxu1 }
 0x1dc   : > { %1202 = shalt.err (!%p1199_p3)
}
 0x1dd   : > { %s1203_s6 = scalar_lea.hbm %s1425_s27, 1152  ;;  %s1207_s9 = scalar_lea.hbm %s1476_s4, 2304 }
 0x1de   : > { %p1204_p4 = scmp.ne.s32.totalorder %s1425_s27, %s1203_s6  ;;  %p1208_p9 = scmp.lt.u32.totalorder %s1425_s27, %s1476_s4 }
 0x1df   : > { %p1209_p10 = scmp.lt.u32.totalorder %s1207_s9, %s1203_s6  ;;  %p1211_p12 = scmp.lt.u32.totalorder %s1203_s6, %s1425_s27 }
 0x1e0   : > { %p1205_p7 = pnand %p1204_p4, %p1323_p5 }
 0x1e1   : > { %p1210_p11 = por %p1209_p10, %p1208_p9 }
 0x1e2   : > { %p1206_p8 = pneg %p1205_p7 }
 0x1e3   : > { %p1212_p13 = por %p1211_p12, %p1210_p11 }
 0x1e5   : > { %p1213_p0 = pnand %p1212_p13, %p1206_p8 }
 0x1e7   : > { %1216 = shalt.err (!%p1213_p0)
}
 0x1e8   : > { %s1258_s12 = smov 128   ;;  %s1259_s13 = smov 8  }
 0x1e9   : > { %1143 = dma.vmem_to_hbm [thread:$0]  (%p1323_p5), %s1427_s20, 1152, %s1425_s27, %s1431_s19, %s1258_s12, %s1258_s12, %s1259_s13  }
 0x1ea PF: > { %p1149_p1 = scmp.ge.s32.totalorder %s1251_s18, 2  ;;  %s989_s14 = sand.u32 1, %s1239_s15  }
 0x1eb   : > { %s990_s22 = scalar_lea.sflag [#allocation3], %s989_s14 }
 0x1ec   : > { %p1146_p2 = pnand %p1149_p1, %p1327_p6 }
 0x1ee   : > { %1234 = dma.done.wait (!%p1146_p2), %s990_s22, 1152  }
 0x1ef   : > { %1236 = vsyncadd (!%p1146_p2), %s990_s22, 4294966144  ;;  %p14_p3 = scmp.ge.s32.totalorder %s1310_s21, 4   ;;  %s1479_s15 = smov %s1243_s16 }
 0x1f0   : > { %s1480_s16 = smov %s1247_s17  ;;  %s1481_s17 = smov %s1321_s24 }
 0x1f1   : > { %s1482_s18 = smov %s1310_s21  ;;  %16 = sbr.rel (!%p14_p3) target bundleno = 3 (0x3), region = 71 }
 0x1f8   :  { %995 = vsyncpa [#allocation3], 1 }
 0x1f9   :  { %997 = vsyncpa [#allocation3 + $0x1], 1 }

</bundles_post_ra>
